<compile_context>
chip_gen: v6e
topology: v6e:2x2x1
jax: 0.10.0
libtpu: 0.0.40
codegen_flags: <defaults>
</compile_context>

<pallas_src>
import functools

import jax
import jax.numpy as jnp
from jax.experimental import pallas as pl
from jax.experimental.pallas import tpu as pltpu

TAU = 1.0
NORM = 1.0
M = 2  # number of views per positive group (hard-coded in the reference)


def _transform_kernel(x_ref, w1_ref, b1_ref, w2_ref, b2_ref, h_ref):
    # TODO(synk): nn.Dropout is identity at inference; training-mode stochastic
    # masking is not reproduced here.
    # bf16 operands on the MXU, f32 accumulation.
    h = jnp.dot(x_ref[...], w1_ref[...], preferred_element_type=jnp.float32)
    h = jnp.maximum(h + b1_ref[...], 0.0)
    h = jnp.dot(h.astype(jnp.bfloat16), w2_ref[...],
                preferred_element_type=jnp.float32) + b2_ref[...]

    # F.normalize(p=2, dim=1) / sqrt(tau) fused into one multiply: rsqrt runs
    # on the EUP (own VLIW slot); the 1e-24 clamp on sum-of-squares matches the
    # reference's 1e-12 clamp on the norm. TAU=1.0 folds away at trace time.
    ss = jnp.sum(h * h, axis=1, keepdims=True)
    inv = jax.lax.rsqrt(jnp.maximum(ss, 1e-24)) * jnp.float32(1.0 / (TAU ** 0.5))
    h_ref[...] = (h * inv).astype(h_ref.dtype)


def _loss_kernel(hrow_ref, hcol_ref, o_ref, m_sc, l_sc, pos_sc, *, n):
    i = pl.program_id(0)
    j = pl.program_id(1)
    rt = hrow_ref.shape[0]
    ct = hcol_ref.shape[0]
    row0 = i * rt
    col0 = j * ct

    @pl.when(j == 0)
    def _():
        m_sc[...] = jnp.full_like(m_sc, -jnp.inf)
        l_sc[...] = jnp.zeros_like(l_sc)
        pos_sc[...] = jnp.zeros_like(pos_sc)

    # Similarity tile: contract the feature axis of both bf16 operands directly
    # on the MXU (no explicit transpose of h), f32 accumulation.
    s = jax.lax.dot_general(
        hrow_ref[...], hcol_ref[...],
        dimension_numbers=(((1,), (1,)), ((), ())),
        preferred_element_type=jnp.float32)

    # Positive-pair logit for global row r is sim[r, (r + n//M) % n]. Its
    # column range for this row tile is [(row0 + n//M) % n, +rt) mod n; gather
    # only on the column tiles that intersect it. (The positive column is never
    # on the diagonal for n >= 2, so gathering from the unmasked s is exact.)
    pos_start = (row0 + n // M) % n
    pos_hit = ((pos_start < col0 + ct)
               & (col0 < jnp.minimum(pos_start + rt, n))
               ) | (col0 < pos_start + rt - n)

    @pl.when(pos_hit)
    def _():
        row_ids = row0 + jax.lax.broadcasted_iota(jnp.int32, (rt, 1), 0)
        col_ids = col0 + jax.lax.broadcasted_iota(jnp.int32, (1, ct), 1)
        pos_col = (row_ids + (n // M)) % n                      # (rt, 1)
        pos_sc[...] += jnp.sum(jnp.where(col_ids == pos_col, s, 0.0),
                               axis=1, keepdims=True)

    # Online log-sum-exp over the row; the diagonal mask is only applied on the
    # column tiles that actually contain diagonal elements.
    def _lse_update(sv):
        m_new = jnp.maximum(m_sc[...], jnp.max(sv, axis=1, keepdims=True))
        alpha = jnp.exp(m_sc[...] - m_new)
        l_sc[...] = alpha * l_sc[...] + jnp.sum(jnp.exp(sv - m_new),
                                                axis=1, keepdims=True)
        m_sc[...] = m_new

    diag_hit = (row0 < col0 + ct) & (col0 < row0 + rt)

    @pl.when(diag_hit)
    def _():
        row_ids = row0 + jax.lax.broadcasted_iota(jnp.int32, (rt, 1), 0)
        col_ids = col0 + jax.lax.broadcasted_iota(jnp.int32, (1, ct), 1)
        _lse_update(jnp.where(row_ids == col_ids, jnp.float32(-1e9), s))

    @pl.when(jnp.logical_not(diag_hit))
    def _():
        _lse_update(s)

    @pl.when(j == pl.num_programs(1) - 1)
    def _():
        # -log p(positive | row) = lse_row - sim[row, pos(row)]
        o_ref[...] = m_sc[...] + jnp.log(l_sc[...]) - pos_sc[...]


def _vmem_limit(estimate_bytes):
    # 2x headroom for compiler temporaries; clamp to v7x's 64 MiB physical VMEM.
    return int(min(max(2 * estimate_bytes, 8 << 20), 64 << 20))


def ntxent_loss(x, w1, b1, w2, b2, *, row_tile=512, col_tile=512):
    """x: (n, H) f32; w1,w2: (H, H) (transpose of torch Linear.weight); b1,b2: (1, H)."""
    n, hidden = x.shape
    assert n % M == 0, "NTXent positive pairing assumes n is a multiple of m=2"
    rt = min(row_tile, n)
    ct = min(col_tile, n)
    assert n % rt == 0 and n % ct == 0, "n must be a multiple of the tile sizes"

    # bf16 operands for the MXU; f32 accumulation stays inside the kernels.
    xb = x.astype(jnp.bfloat16)
    w1b = w1.astype(jnp.bfloat16)
    w2b = w2.astype(jnp.bfloat16)
    b1f = b1.astype(jnp.float32)
    b2f = b2.astype(jnp.float32)

    # Row-tiled transform + fused normalize. Weights/biases get constant
    # index_maps so they stay VMEM-resident across row tiles.
    # TODO(synk): for production hidden on v7x, add pipeline_mode=pl.Buffered(1)
    # on the constant-index weight specs and a K/N grid axis + f32 accumulator
    # once hidden grows beyond ~2k (64 MiB VMEM budget).
    est_t = (2 * rt * hidden * 2            # x tile (bf16, double-buffered)
             + 2 * 2 * hidden * hidden * 2  # w1, w2 (bf16, conservatively x2)
             + 2 * 2 * hidden * 4           # b1, b2 (f32)
             + 2 * rt * hidden * 2          # h output tile (bf16)
             + 3 * rt * hidden * 4)         # f32 intermediates
    h = pl.pallas_call(
        _transform_kernel,
        out_shape=jax.ShapeDtypeStruct((n, hidden), jnp.bfloat16),
        grid=(n // rt,),
        in_specs=[
            pl.BlockSpec((rt, hidden), lambda i: (i, 0)),
            pl.BlockSpec((hidden, hidden), lambda i: (0, 0)),
            pl.BlockSpec((1, hidden), lambda i: (0, 0)),
            pl.BlockSpec((hidden, hidden), lambda i: (0, 0)),
            pl.BlockSpec((1, hidden), lambda i: (0, 0)),
        ],
        out_specs=pl.BlockSpec((rt, hidden), lambda i: (i, 0)),
        compiler_params=pltpu.CompilerParams(
            dimension_semantics=("parallel",),
            vmem_limit_bytes=_vmem_limit(est_t)),
    )(xb, w1b, b1f, w2b, b2f)

    # Flash-style tiled masked log-softmax + positive-pair reduction.
    # Per-row -log p(positive) goes to a disjoint (rt, 1) block per row tile so
    # the row axis is "parallel" (v7x megacore); the column/softmax axis is
    # last and carries the per-row-tile scratch. VMEM use is O(rt*ct +
    # (rt+ct)*hidden) independent of n.
    # TODO(synk): if profiling on v5e shows the hcol DMA exposed, bump its spec
    # to pipeline_mode=pl.Buffered(3).
    est_l = (2 * rt * hidden * 2 + 2 * ct * hidden * 2  # hrow / hcol (bf16)
             + 2 * rt * 4 + 3 * rt * 4                  # output + scratch
             + 4 * rt * ct * 4)                         # live f32 (rt, ct) tiles
    per_row = pl.pallas_call(
        functools.partial(_loss_kernel, n=n),
        out_shape=jax.ShapeDtypeStruct((n, 1), jnp.float32),
        grid=(n // rt, n // ct),
        in_specs=[
            pl.BlockSpec((rt, hidden), lambda i, j: (i, 0)),
            pl.BlockSpec((ct, hidden), lambda i, j: (j, 0)),
        ],
        out_specs=pl.BlockSpec((rt, 1), lambda i, j: (i, 0)),
        scratch_shapes=[
            pltpu.VMEM((rt, 1), jnp.float32),  # running row max
            pltpu.VMEM((rt, 1), jnp.float32),  # running sum of exp
            pltpu.VMEM((rt, 1), jnp.float32),  # positive-pair logit
        ],
        compiler_params=pltpu.CompilerParams(
            dimension_semantics=("parallel", "arbitrary"),
            vmem_limit_bytes=_vmem_limit(est_l)),
    )(h, h)

    return jnp.sum(per_row) / (n * (M - 1) * NORM)


def _reference(x, w1, b1, w2, b2):
    h = jnp.maximum(x @ w1 + b1, 0.0) @ w2 + b2
    h = h / jnp.maximum(jnp.linalg.norm(h, axis=1, keepdims=True), 1e-12)
    h = h / jnp.sqrt(TAU)
    sim = h @ h.T
    n = x.shape[0]
    sim = sim.at[jnp.arange(n), jnp.arange(n)].set(-1e9)
    logprob = jax.nn.log_softmax(sim, axis=1)
    labels = (jnp.arange(n) + n // M) % n
    return -logprob[jnp.arange(n), labels].sum() / n / (M - 1) / NORM


if __name__ == "__main__":
    n, hidden = 8, 32  # n samples (pairs: i <-> i + n/2), hidden_size = 32

    key = jax.random.PRNGKey(0)
    kx, kw1, kb1, kw2, kb2 = jax.random.split(key, 5)
    x = jax.random.normal(kx, (n, hidden), dtype=jnp.float32)
    # deterministic synthetic Linear params (uniform ~ torch default scale)
    bound = 1.0 / jnp.sqrt(hidden)
    w1 = jax.random.uniform(kw1, (hidden, hidden), jnp.float32, -bound, bound)
    b1 = jax.random.uniform(kb1, (1, hidden), jnp.float32, -bound, bound)
    w2 = jax.random.uniform(kw2, (hidden, hidden), jnp.float32, -bound, bound)
    b2 = jax.random.uniform(kb2, (1, hidden), jnp.float32, -bound, bound)

    loss = ntxent_loss(x, w1, b1, w2, b2)
    jax.block_until_ready(loss)

    ref = _reference(x, w1, b1, w2, b2)
    # Looser tolerance than the f32 version: the MXU paths now run on bf16
    # operands (f32 accumulation), which is the intended training-loss config.
    assert jnp.allclose(loss, ref, rtol=5e-2, atol=5e-2), (loss, ref)

    print("KERNEL_OK")
</pallas_src>

<mosaic_0001>
module attributes {stable_mosaic.version = 11 : i64} {
  func.func @_transform_kernel(%arg0: i32, %arg1: memref<8x32xbf16, #tpu.memory_space<vmem>>, %arg2: memref<32x32xbf16, #tpu.memory_space<vmem>>, %arg3: memref<1x32xf32, #tpu.memory_space<vmem>>, %arg4: memref<32x32xbf16, #tpu.memory_space<vmem>>, %arg5: memref<1x32xf32, #tpu.memory_space<vmem>>, %arg6: memref<8x32xbf16, #tpu.memory_space<vmem>>) attributes {dimension_semantics = [#tpu.dimension_semantics<parallel>], iteration_bounds = array<i64: 1>, scalar_prefetch = 0 : i64, scratch_operands = 0 : i64, tpu.core_type = #tpu.core_type<tc>, window_params = [{transform_indices = @transform_0, window_bounds = array<i64: 8, 32>}, {pipeline_mode = #tpu.pipeline_mode<synchronous>, transform_indices = @transform_1, window_bounds = array<i64: 32, 32>}, {pipeline_mode = #tpu.pipeline_mode<synchronous>, transform_indices = @transform_2, window_bounds = array<i64: 1, 32>}, {pipeline_mode = #tpu.pipeline_mode<synchronous>, transform_indices = @transform_3, window_bounds = array<i64: 32, 32>}, {pipeline_mode = #tpu.pipeline_mode<synchronous>, transform_indices = @transform_4, window_bounds = array<i64: 1, 32>}, {transform_indices = @transform_5, window_bounds = array<i64: 8, 32>}]} {
    %c0 = arith.constant 0 : index
    %c0_0 = arith.constant 0 : index
    %0 = vector.load %arg1[%c0, %c0_0] : memref<8x32xbf16, #tpu.memory_space<vmem>>, vector<8x32xbf16>
    %c0_1 = arith.constant 0 : index
    %c0_2 = arith.constant 0 : index
    %1 = vector.load %arg2[%c0_1, %c0_2] : memref<32x32xbf16, #tpu.memory_space<vmem>>, vector<32x32xbf16>
    %cst = arith.constant dense<0.000000e+00> : vector<8x32xf32>
    %2 = tpu.matmul %0, %1, %cst {dimension_numbers = #tpu.dot_dimension_numbers<[1], [0], [0], [1], [0, 0, 1, 1], [], []>} : vector<8x32xbf16>, vector<32x32xbf16>, vector<8x32xf32> -> vector<8x32xf32>
    %c0_3 = arith.constant 0 : index
    %c0_4 = arith.constant 0 : index
    %3 = vector.load %arg3[%c0_3, %c0_4] : memref<1x32xf32, #tpu.memory_space<vmem>>, vector<1x32xf32>
    %4 = vector.broadcast %3 : vector<1x32xf32> to vector<8x32xf32>
    %5 = arith.addf %2, %4 : vector<8x32xf32>
    %cst_5 = arith.constant 0.000000e+00 : f32
    %6 = vector.broadcast %cst_5 : f32 to vector<8x32xf32>
    %7 = arith.maximumf %5, %6 : vector<8x32xf32>
    %8 = arith.truncf %7 : vector<8x32xf32> to vector<8x32xbf16>
    %c0_6 = arith.constant 0 : index
    %c0_7 = arith.constant 0 : index
    %9 = vector.load %arg4[%c0_6, %c0_7] : memref<32x32xbf16, #tpu.memory_space<vmem>>, vector<32x32xbf16>
    %cst_8 = arith.constant dense<0.000000e+00> : vector<8x32xf32>
    %10 = tpu.matmul %8, %9, %cst_8 {dimension_numbers = #tpu.dot_dimension_numbers<[1], [0], [0], [1], [0, 0, 1, 1], [], []>} : vector<8x32xbf16>, vector<32x32xbf16>, vector<8x32xf32> -> vector<8x32xf32>
    %c0_9 = arith.constant 0 : index
    %c0_10 = arith.constant 0 : index
    %11 = vector.load %arg5[%c0_9, %c0_10] : memref<1x32xf32, #tpu.memory_space<vmem>>, vector<1x32xf32>
    %12 = vector.broadcast %11 : vector<1x32xf32> to vector<8x32xf32>
    %13 = arith.addf %10, %12 : vector<8x32xf32>
    %14 = arith.mulf %13, %13 : vector<8x32xf32>
    %cst_11 = arith.constant dense<0.000000e+00> : vector<8xf32>
    %15 = vector.multi_reduction <add>, %14, %cst_11 [1] : vector<8x32xf32> to vector<8xf32>
    %16 = vector.shape_cast %15 : vector<8xf32> to vector<8x1xf32>
    %cst_12 = arith.constant 1.000000e-24 : f32
    %17 = vector.broadcast %cst_12 : f32 to vector<8x1xf32>
    %18 = arith.maximumf %16, %17 : vector<8x1xf32>
    %19 = math.rsqrt %18 : vector<8x1xf32>
    %cst_13 = arith.constant 1.000000e+00 : f32
    %20 = vector.broadcast %cst_13 : f32 to vector<8x1xf32>
    %21 = arith.mulf %19, %20 : vector<8x1xf32>
    %22 = vector.broadcast %21 : vector<8x1xf32> to vector<8x32xf32>
    %23 = arith.mulf %13, %22 : vector<8x32xf32>
    %24 = arith.truncf %23 : vector<8x32xf32> to vector<8x32xbf16>
    %c0_14 = arith.constant 0 : index
    %c0_15 = arith.constant 0 : index
    %25 = vector.load %arg6[%c0_14, %c0_15] : memref<8x32xbf16, #tpu.memory_space<vmem>>, vector<8x32xbf16>
    tpu.vector_store %arg6[%c0_14, %c0_15], %24 {strides = array<i32>} : memref<8x32xbf16, #tpu.memory_space<vmem>>, vector<8x32xbf16>,
    return
  }
  func.func @transform_0(%arg0: i32) -> (i32, i32) {
    %c0_i32 = arith.constant 0 : i32
    %c0_i32_0 = arith.constant 0 : i32
    return %arg0, %c0_i32 : i32, i32
  }
  func.func @transform_1(%arg0: i32) -> (i32, i32) {
    %c0_i32 = arith.constant 0 : i32
    %c0_i32_0 = arith.constant 0 : i32
    %c0_i32_1 = arith.constant 0 : i32
    return %c0_i32, %c0_i32_0 : i32, i32
  }
  func.func @transform_2(%arg0: i32) -> (i32, i32) {
    %c0_i32 = arith.constant 0 : i32
    %c0_i32_0 = arith.constant 0 : i32
    %c0_i32_1 = arith.constant 0 : i32
    return %c0_i32, %c0_i32_0 : i32, i32
  }
  func.func @transform_3(%arg0: i32) -> (i32, i32) {
    %c0_i32 = arith.constant 0 : i32
    %c0_i32_0 = arith.constant 0 : i32
    %c0_i32_1 = arith.constant 0 : i32
    return %c0_i32, %c0_i32_0 : i32, i32
  }
  func.func @transform_4(%arg0: i32) -> (i32, i32) {
    %c0_i32 = arith.constant 0 : i32
    %c0_i32_0 = arith.constant 0 : i32
    %c0_i32_1 = arith.constant 0 : i32
    return %c0_i32, %c0_i32_0 : i32, i32
  }
  func.func @transform_5(%arg0: i32) -> (i32, i32) {
    %c0_i32 = arith.constant 0 : i32
    %c0_i32_0 = arith.constant 0 : i32
    return %arg0, %c0_i32 : i32, i32
  }
}

</mosaic_0001>

<bundles_post_ra>
// kernel: tpu_custom_call.1
= control target key start
LH: loop header
LB: loop body
LE: loop exit
PB: predicated region body
PF: predicated region fallthrough
CT: control target
= control target key end

     0   :  { %10 = vsyncpa [#allocation3], 0  ;;  %s412_s0 = inlined_call_operand.hbm [shape: bf16[8,32], index: 0, kind: input, shape index: {}]   ;;  %s413_s1 = inlined_call_operand.hbm [shape: bf16[32,32], index: 1, kind: input, shape index: {}]   ;;  %s414_s2 = inlined_call_operand.vmem [shape: f32[1,32], index: 2, kind: input, shape index: {}]   ;;  %s415_s3 = inlined_call_operand.hbm [shape: bf16[32,32], index: 3, kind: input, shape index: {}]   ;;  %s416_s4 = inlined_call_operand.vmem [shape: f32[1,32], index: 4, kind: input, shape index: {}]   ;;  %s417_s5 = inlined_call_operand.hbm [shape: bf16[8,32], index: 5, kind: output, shape index: {}]  }
   0x1   :  { %11 = vsyncpa [#allocation6], 0 }
   0x2   :  { %12 = vsyncpa [#allocation4], 0  ;;  %s353_s18 = smov [#allocation5]  }
   0x3   :  { %s28_s19 = sshll.u32 %s353_s18, 4  ;;  %s29_s19 = int_to_ptr.vmem [resolvable:$true] %s28_s19 }
   0x4   :  { %s275_s20 = scalar_lea.vmem %s29_s19, 256  ;;  %p280_p1 = scmp.lt.s32.totalorder %s29_s19, %s29_s19 }
   0x5   :  { %p276_p0 = scmp.ne.s32.totalorder %s29_s19, %s275_s20  ;;  %p281_p2 = scmp.lt.s32.totalorder %s275_s20, %s275_s20 }
   0x7   :  { %p282_p3 = por %p281_p2, %p280_p1 }
   0x9   :  { %p283_p4 = pnand %p282_p3, %p276_p0 }
   0xb   :  { %286 = shalt.err (!%p283_p4)
}
   0xc   :  { %s354_s21 = smov 64   ;;  %s355_s22 = smov 4  }
   0xd   :  { %34 = dma.hbm_to_vmem [thread:$0]  %s413_s1, 256, %s29_s19, [#allocation6], %s354_s21, %s354_s21, %s355_s22  }
   0xe   :  { %s356_s25 = smov [#allocation2]   ;;  %s357_s27 = smov [#allocation7]  }
   0xf   :  { %s19_s26 = sshll.u32 %s356_s25, 4  ;;  %s42_s28 = sshll.u32 %s357_s27, 4  ;;  %s20_s26 = int_to_ptr.vmem [resolvable:$true] %s19_s26  ;;  %s43_s28 = int_to_ptr.vmem [resolvable:$true] %s42_s28 }
  0x10   :  { %s295_s29 = scalar_lea.vmem %s20_s26, 64  ;;  %p300_p6 = scmp.lt.s32.totalorder %s20_s26, %s20_s26 }
  0x11   :  { %p296_p5 = scmp.ne.s32.totalorder %s20_s26, %s295_s29  ;;  %p301_p7 = scmp.lt.s32.totalorder %s295_s29, %s295_s29 }
  0x13   :  { %p302_p8 = por %p301_p7, %p300_p6 }
  0x15   :  { %p303_p9 = pnand %p302_p8, %p296_p5 }
  0x17   :  { %306 = shalt.err (!%p303_p9)
}
  0x18   :  { %22 = dma.hbm_to_vmem [thread:$0]  %s412_s0, 64, %s20_s26, [#allocation3]  }
  0x19   :  { %s315_s7 = scalar_lea.vmem %s43_s28, 256  ;;  %p320_p11 = scmp.lt.s32.totalorder %s43_s28, %s43_s28 }
  0x1a   :  { %p316_p10 = scmp.ne.s32.totalorder %s43_s28, %s315_s7  ;;  %p321_p12 = scmp.lt.s32.totalorder %s315_s7, %s315_s7 }
  0x1c   :  { %p322_p13 = por %p321_p12, %p320_p11 }
  0x1e   :  { %p323_p0 = pnand %p322_p13, %p316_p10 }
  0x20   :  { %326 = shalt.err (!%p323_p0)
}
  0x21   :  { %48 = dma.hbm_to_vmem [thread:$0]  %s415_s3, 256, %s43_s28, [#allocation6], %s354_s21, %s354_s21, %s355_s22  }
  0x22   :  { %347 = dma.done.wait [#allocation3], 64  }
  0x23   :  { %348 = vsyncadd [#allocation3], 4294967232 }
  0x24   :  { %349 = dma.done.wait [#allocation6], 512  }
  0x25   :  { %350 = vsyncadd [#allocation6], 4294966784  ;;  %v358_v0 = vmov 0.0   ;;  %vm359_vm0 = vmmov 0   ;;  %v261_v1 = vld [vmem:[#allocation5 + $0x8] sm:$0xff]   ;;  %v262_v2 = vld [vmem:[#allocation5] sm:$0xff]  }
  0x26   :  { %237 = vmatprep.subr.bf16.mxu0 %v358_v0  ;;  %241 = vmatprep.mubr.msk.bf16.mxu0 %vm359_vm0, %v358_v0  ;;  %v61_v3 = vld [vmem:[#allocation2] sm:$0xf]  ;;  %vm85_vm1 = vcmask 261120   ;;  %v264_v5 = vld [vmem:[#allocation7] sm:$0xff]   ;;  %vm205_vm2 = vcmask 257024  }
  0x27   :  { %245 = vmatprep.subr.bf16.mxu1 %v358_v0  ;;  %249 = vmatprep.mubr.msk.bf16.mxu1 %vm359_vm0, %v358_v0  ;;  %v263_v4 = vld [vmem:[#allocation7 + $0x8] sm:$0xff]  }
  0x28   :  { %238 = vmatpush3.bf16.msra.mxu0 %v261_v1  ;;  %246 = vmatpush3.bf16.msra.mxu1 %v263_v4  ;;  %v223_v6 = vld [vmem:[%s414_s2] ss:$0 sm:$0xff]  ;;  %s360_s2 = smov [#allocation8]  }
  0x29   :  { %239 = vmatprep.subr.bf16.mxu0 %v358_v0  ;;  %247 = vmatprep.subr.bf16.mxu1 %v358_v0  ;;  %v227_v14 = vld [vmem:[%s416_s4] ss:$0 sm:$0xff]  ;;  %s213_s11 = sshll.u32 %s360_s2, 4  ;;  %s214_s11 = int_to_ptr.vmem [resolvable:$true] %s213_s11 }
  0x2a   :  { %s327_s4 = scalar_lea.vmem %s214_s11, 64  ;;  %p332_p2 = scmp.lt.s32.totalorder %s214_s11, %s214_s11 }
  0x2b   :  { %p328_p1 = scmp.ne.s32.totalorder %s214_s11, %s327_s4  ;;  %p333_p3 = scmp.lt.s32.totalorder %s327_s4, %s327_s4 }
  0x2c   :  { %240 = vmatpush3.bf16.msra.mxu0 %v262_v2  ;;  %248 = vmatpush3.bf16.msra.mxu1 %v264_v5 }
  0x2d   :  { %p334_p4 = por %p333_p3, %p332_p2 }
  0x2f   :  { %242 = vmatmul.mubr.msk.bf16.vlgmr.msra.gmra.mxu0 %vm85_vm1, %v61_v3  ;;  %p335_p5 = pnand %p334_p4, %p328_p1 }
  0xef   :  { %v123_v7 = vpop.f32.mrf.mxu0 }
  0xf0   :  { %v124_v8 = vadd.f32 %v223_v6, %v123_v7 }
  0xf1   :  { %v243_v9 = vpop.f32.mrf.mxu0 }
  0xf2   :  { %v129_v10 = vmax.f32 %v124_v8, 0.0 }
  0xf3   :  { %v126_v11 = vpop.f32.mrf.mxu0 }
  0xf4   :  { %v130_v12 = vpack.c.bf16 %v129_v10, %v129_v10 }
  0xf5   :  { %v244_v13 = vpop.f32.mrf.mxu0 }
  0xf6   :  { %250 = vmatmul.mubr.msk.bf16.vlgmr.msra.gmra.mxu1 %vm85_vm1, %v130_v12 }
 0x1b6   :  { %v191_v15 = vpop.f32.mrf.mxu1 }
 0x1b7   :  { %v192_v16 = vadd.f32 %v227_v14, %v191_v15 }
 0x1b8   :  { %v251_v17 = vpop.f32.mrf.mxu1 }
 0x1b9   :  { %v197_v18 = vmul.f32 %v192_v16, %v192_v16 }
 0x1ba   :  { %v194_v19 = vpop.f32.mrf.mxu1 }
 0x1bb   :  { %v198_v20 = vsel %vm85_vm1, %v197_v18, 0.0 }
 0x1bc   :  { %v252_v21 = vpop.f32.mrf.mxu1  ;;  %199 = vadd.xlane.f32.xlu0 %v198_v20 }
 0x245   :  { %v200_v22 = vpop.xlane.xlu0 %199 }
 0x246   :  { %v201_v23 = vmax.f32 %v200_v22, 1e-24 }
 0x248   :  { %265 = vrsqrt.f32 %v201_v23 }
 0x255   :  { %v266_v24 = vpop.eup %265 }
 0x256   :  { %v203_v25 = vmul.f32 %v266_v24, %v192_v16 }
 0x258   :  { %v204_v26 = vpack.c.bf16 %v203_v25, %v203_v25 }
 0x25a   :  { %206 = vst.msk [vmem:[#allocation8] sm:$0xf] %vm205_vm2, %v204_v26 }
 0x25b   :  { %338 = shalt.err (!%p335_p5)
}
 0x25c   :  { %216 = dma.vmem_to_hbm [thread:$0]  %s214_s11, 64, %s417_s5, [#allocation4]  }
 0x25d   :  { %351 = dma.done.wait [#allocation4], 64  }
 0x25e   :  { %352 = vsyncadd [#allocation4], 4294967232 }
 0x25f   :  { %220 = vsyncpa [#allocation3], 1 }
 0x260   :  { %221 = vsyncpa [#allocation6], 1 }
 0x261   :  { %222 = vsyncpa [#allocation4], 1 }

</bundles_post_ra>
